<compile_context>
chip_gen: v7x
topology: tpu7x:2x2x1
jax: 0.10.0
libtpu: 0.0.40
codegen_flags: <defaults>
</compile_context>

<pallas_src>
import jax
import jax.numpy as jnp
from jax.experimental import pallas as pl
from jax.experimental.pallas import tpu as pltpu


def _attention_kernel(x_ref, w_ref, o_ref):
    # x_ref: (TB, S, F)  block of batch rows
    # w_ref: (1, F)      linear weight (PyTorch layout: out_features x in_features)
    # o_ref: (TB, S)     softmax weights, lane-dense (S on the lane axis)
    x = x_ref[...]                                  # (TB, S, F)
    w = w_ref[0]                                    # (F,)

    # Linear (bias omitted: softmax over a 1-output linear is bias-invariant).
    # VPU multiply + cross-lane reduce over F -> lane-dense (TB, S) scores.
    scores = jnp.sum(x * w, axis=-1)                # (TB, S), f32

    # Numerically stable softmax over the sequence axis (last axis here).
    m = jnp.max(scores, axis=-1, keepdims=True)     # (TB, 1)
    e = jnp.exp(scores - m)                         # (TB, S)
    denom = jnp.sum(e, axis=-1, keepdims=True)      # (TB, 1)
    probs = e * pl.reciprocal(denom, approx=False)  # exact f32 softmax weights

    o_ref[...] = probs.astype(o_ref.dtype)


def attention_forward(tens, weight, bias=None, *, tb=None):
    """tens: (B, S, 2H) f32, weight: (1, 2H) f32, bias: (1,) f32 (ignored; softmax
    over a single-output linear is bias-invariant) -> (B, 1, S) f32."""
    del bias  # mathematically a no-op on the output
    B, S, F = tens.shape
    assert weight.shape == (1, F)

    # --- choose batch tile (rows per grid step) ---------------------------
    if tb is None:
        bytes_per_row = S * F * 4
        target_block_bytes = 4 * 1024 * 1024          # ~4 MiB input block/step
        tb = max(1, min(B, target_block_bytes // max(bytes_per_row, 1)))
        # Keep >=2 grid steps when batch allows (v7x has 2 TensorCores/chip).
        if tb >= B and B >= 16:
            tb = B // 2
    tb = min(tb, B)
    # Output block is (tb, S): its sublane dim must be a multiple of 8 unless
    # it spans the whole batch dim.
    if tb < B and tb % 8 != 0:
        tb = max(8, (tb // 8) * 8)

    num_blocks = pl.cdiv(B, tb)
    Bp = num_blocks * tb
    if Bp != B:
        tens = jnp.pad(tens, ((0, Bp - B), (0, 0), (0, 0)))

    # VMEM budget: double-buffered input + output blocks, plus the weight row.
    vmem_needed = 2 * (tb * S * F * 4 + tb * S * 4) + F * 4
    vmem_limit = int(min(64 * 1024 * 1024, max(32 * 1024 * 1024, 4 * vmem_needed)))

    out2d = pl.pallas_call(
        _attention_kernel,
        out_shape=jax.ShapeDtypeStruct((Bp, S), jnp.float32),
        grid_spec=pltpu.PrefetchScalarGridSpec(
            num_scalar_prefetch=0,
            grid=(num_blocks,),
            in_specs=[
                pl.BlockSpec((tb, S, F), lambda i: (i, 0, 0)),
                pl.BlockSpec((1, F), lambda i: (0, 0)),
            ],
            out_specs=pl.BlockSpec((tb, S), lambda i: (i, 0)),
        ),
        compiler_params=pltpu.CompilerParams(
            dimension_semantics=("parallel",),
            vmem_limit_bytes=vmem_limit,
        ),
    )(tens, weight)

    # permute(0, 2, 1) of the (B, S, 1) softmax == (B, 1, S): free reshape in XLA.
    return out2d[:B][:, None, :]


def attention_reference(tens, weight, bias):
    scores = jnp.einsum("bsf,of->bso", tens, weight) + bias  # (B, S, 1)
    w = jax.nn.softmax(scores, axis=1)
    return jnp.transpose(w, (0, 2, 1))                       # (B, 1, S)


if __name__ == "__main__":
    # Small, module-consistent shapes: batch=2, seq=8, hidden=16 -> in_features=32.
    B, S, H = 2, 8, 16
    F = 2 * H

    key = jax.random.PRNGKey(0)
    k_x, k_w, k_b = jax.random.split(key, 3)

    tens = jax.random.normal(k_x, (B, S, F), dtype=jnp.float32)
    # Deterministic init mimicking nn.Linear default (uniform in +-1/sqrt(fan_in)).
    bound = 1.0 / jnp.sqrt(jnp.float32(F))
    weight = jax.random.uniform(k_w, (1, F), minval=-bound, maxval=bound,
                                dtype=jnp.float32)
    bias = jax.random.uniform(k_b, (1,), minval=-bound, maxval=bound,
                              dtype=jnp.float32)

    out = attention_forward(tens, weight, bias)
    out = jax.block_until_ready(out)

    ref = attention_reference(tens, weight, bias)
    assert out.shape == (B, 1, S)
    assert jnp.allclose(out, ref, atol=1e-5, rtol=1e-5), "mismatch vs JAX reference"

    print("KERNEL_OK")
</pallas_src>

<mosaic_0001>
module attributes {stable_mosaic.version = 11 : i64} {
  func.func @_attention_kernel(%arg0: i32, %arg1: memref<2x8x32xf32, #tpu.memory_space<vmem>>, %arg2: memref<1x32xf32, #tpu.memory_space<vmem>>, %arg3: memref<2x8xf32, #tpu.memory_space<vmem>>) attributes {dimension_semantics = [#tpu.dimension_semantics<parallel>], iteration_bounds = array<i64: 1>, scalar_prefetch = 0 : i64, scratch_operands = 0 : i64, tpu.core_type = #tpu.core_type<tc>, window_params = [{transform_indices = @transform_0, window_bounds = array<i64: 2, 8, 32>}, {pipeline_mode = #tpu.pipeline_mode<synchronous>, transform_indices = @transform_1, window_bounds = array<i64: 1, 32>}, {transform_indices = @transform_2, window_bounds = array<i64: 2, 8>}]} {
    %c0 = arith.constant 0 : index
    %c0_0 = arith.constant 0 : index
    %c0_1 = arith.constant 0 : index
    %0 = vector.load %arg1[%c0, %c0_0, %c0_1] : memref<2x8x32xf32, #tpu.memory_space<vmem>>, vector<2x8x32xf32>
    %c0_2 = arith.constant 0 : index
    %c0_3 = arith.constant 0 : index
    %1 = vector.load %arg2[%c0_2, %c0_3] : memref<1x32xf32, #tpu.memory_space<vmem>>, vector<1x32xf32>
    %2 = vector.shape_cast %1 : vector<1x32xf32> to vector<32xf32>
    %3 = vector.shape_cast %2 : vector<32xf32> to vector<1x1x32xf32>
    %4 = vector.broadcast %3 : vector<1x1x32xf32> to vector<2x8x32xf32>
    %5 = arith.mulf %0, %4 : vector<2x8x32xf32>
    %cst = arith.constant dense<0.000000e+00> : vector<2x8xf32>
    %6 = vector.multi_reduction <add>, %5, %cst [2] : vector<2x8x32xf32> to vector<2x8xf32>
    %cst_4 = arith.constant dense<0xFF800000> : vector<2xf32>
    %7 = vector.multi_reduction <maximumf>, %6, %cst_4 [1] : vector<2x8xf32> to vector<2xf32>
    %8 = vector.shape_cast %7 : vector<2xf32> to vector<2x1xf32>
    %9 = vector.broadcast %8 : vector<2x1xf32> to vector<2x8xf32>
    %10 = arith.subf %6, %9 : vector<2x8xf32>
    %11 = math.exp %10 : vector<2x8xf32>
    %cst_5 = arith.constant dense<0.000000e+00> : vector<2xf32>
    %12 = vector.multi_reduction <add>, %11, %cst_5 [1] : vector<2x8xf32> to vector<2xf32>
    %13 = vector.shape_cast %12 : vector<2xf32> to vector<2x1xf32>
    %14 = tpu.reciprocal %13 : vector<2x1xf32> -> vector<2x1xf32>
    %15 = vector.broadcast %14 : vector<2x1xf32> to vector<2x8xf32>
    %16 = arith.mulf %11, %15 : vector<2x8xf32>
    %c0_6 = arith.constant 0 : index
    %c0_7 = arith.constant 0 : index
    %17 = vector.load %arg3[%c0_6, %c0_7] : memref<2x8xf32, #tpu.memory_space<vmem>>, vector<2x8xf32>
    tpu.vector_store %arg3[%c0_6, %c0_7], %16 {strides = array<i32>} : memref<2x8xf32, #tpu.memory_space<vmem>>, vector<2x8xf32>,
    return
  }
  func.func @transform_0(%arg0: i32) -> (i32, i32, i32) {
    %c0_i32 = arith.constant 0 : i32
    %c0_i32_0 = arith.constant 0 : i32
    %c0_i32_1 = arith.constant 0 : i32
    return %arg0, %c0_i32, %c0_i32_0 : i32, i32, i32
  }
  func.func @transform_1(%arg0: i32) -> (i32, i32) {
    %c0_i32 = arith.constant 0 : i32
    %c0_i32_0 = arith.constant 0 : i32
    %c0_i32_1 = arith.constant 0 : i32
    return %c0_i32, %c0_i32_0 : i32, i32
  }
  func.func @transform_2(%arg0: i32) -> (i32, i32) {
    %c0_i32 = arith.constant 0 : i32
    %c0_i32_0 = arith.constant 0 : i32
    return %arg0, %c0_i32 : i32, i32
  }
}

</mosaic_0001>

<bundles_post_ra>
// kernel: tpu_custom_call.1
= control target key start
LH: loop header
LB: loop body
LE: loop exit
PB: predicated region body
PF: predicated region fallthrough
CT: control target
= control target key end

     0   :  { %7 = vsyncpa [#allocation3], 0  ;;  %s264_s0 = inlined_call_operand.hbm [shape: f32[2,8,32], index: 0, kind: input, shape index: {}]   ;;  %s265_s1 = inlined_call_operand.vmem [shape: f32[1,32], index: 1, kind: input, shape index: {}]   ;;  %s266_s2 = inlined_call_operand.hbm [shape: f32[2,8], index: 2, kind: output, shape index: {}]  }
   0x1   :  { %8 = vsyncpa [#allocation4], 0  ;;  %s211_s9 = smov [#allocation2]   ;;  %s163_s13 = scalar_lea.hbm %s264_s0, 256 }
   0x2   :  { %s14_s10 = sshll.u32 %s211_s9, 4  ;;  %p164_p0 = scmp.ne.s32.totalorder %s264_s0, %s163_s13  ;;  %s15_s10 = int_to_ptr.vmem [resolvable:$true] %s14_s10 }
   0x3   :  { %p167_p1 = scmp.lt.u32.totalorder %s163_s13, %s264_s0 }
   0x5   :  { %p169_p2 = pnand %p167_p1, %p164_p0 }
   0x7   :  { %172 = shalt.err (!%p169_p2)
}
   0x8   :  { %s173_s18 = scalar_lea.vmem %s15_s10, 256  ;;  %p178_p4 = scmp.lt.s32.totalorder %s15_s10, %s15_s10 }
   0x9   :  { %p174_p3 = scmp.ne.s32.totalorder %s15_s10, %s173_s18  ;;  %p179_p5 = scmp.lt.s32.totalorder %s173_s18, %s173_s18 }
   0xb   :  { %p180_p6 = por %p179_p5, %p178_p4 }
   0xd   :  { %p181_p7 = pnand %p180_p6, %p174_p3 }
   0xf   :  { %184 = shalt.err (!%p181_p7)
}
  0x10   :  { %s212_s19 = smov 128   ;;  %s213_s20 = smov 8  }
  0x11   :  { %20 = dma.hbm_to_vmem [thread:$0]  %s264_s0, 256, %s15_s10, [#allocation3], %s212_s19, %s212_s19, %s213_s20  }
  0x12   :  { %207 = dma.done.wait [#allocation3], 256  }
  0x13   :  { %208 = vsyncadd [#allocation3], 4294967040  ;;  %v26_v0 = vld [vmem:[#allocation2] sm:$0xff]  ;;  %vm37_vm0 = vcmask 261120   ;;  %v27_v2 = vld [vmem:[#allocation2 + $0x8] sm:$0xff]  ;;  %v46_v7 = vlaneseq  ;;  %vm56_vm1 = vcmask 1041409  }
  0x14   :  { %v149_v1 = vld [vmem:[%s265_s1] ss:$0 sm:$0xff]  ;;  %vm59_vm2 = vcmask 58368   ;;  %v214_v17 = vmov 0   ;;  %s215_s0 = smov [#allocation5]  }
  0x15   :  { %v35_v3 = vmul.f32 %v149_v1, %v26_v0  ;;  %v36_v4 = vmul.f32 %v149_v1, %v27_v2  ;;  %v47_v8 = vand.u32 127, %v46_v7  ;;  %v49_v9 = vshrl.u32 %v46_v7, 7  ;;  %156 = vset.pattern.permute.xlu0 %v214_v17  ;;  %155 = vset.pattern.permute.xlu1 %v214_v17  ;;  %s140_s1 = sshll.u32 %s215_s0, 4  ;;  %s141_s1 = int_to_ptr.vmem [resolvable:$true] %s140_s1 }
  0x16   :  { %s185_s25 = scalar_lea.vmem %s141_s1, 32  ;;  %p190_p9 = scmp.lt.s32.totalorder %s141_s1, %s141_s1 }
  0x17   :  { %v38_v5 = vsel %vm37_vm0, %v35_v3, 0.0  ;;  %v41_v6 = vsel %vm37_vm0, %v36_v4, 0.0  ;;  %v50_v11 = vsub.s32 %v47_v8, %v49_v9  ;;  %v66_v18 = vsub.s32 0, %v49_v9  ;;  %p186_p8 = scmp.ne.s32.totalorder %s141_s1, %s185_s25  ;;  %p191_p10 = scmp.lt.s32.totalorder %s185_s25, %s185_s25 }
  0x18   :  { %39 = vadd.xlane.f32.xlu0 %v38_v5  ;;  %v70_v19 = vsub.s32 1, %v49_v9 }
  0x19   :  { %p192_p11 = por %p191_p10, %p190_p9 }
  0x1b   :  { %p193_p12 = pnand %p192_p11, %p186_p8 }
  0x1c   :  { %42 = vadd.xlane.f32.xlu0 %v41_v6 }
  0xa5   :  { %v40_v10 = vpop.xlane.xlu0 %39 }
  0xa6   :  { %v51_v13 = vrot.slane %v40_v10, %v50_v11 }
  0xa9   :  { %v43_v12 = vpop.xlane.xlu0 %42 }
  0xaa   :  { %v55_v14 = vrot.slane %v43_v12, %v50_v11 }
  0xac   :  { %v57_v15 = vsel %vm56_vm1, %v55_v14, %v51_v13 }
  0xad   :  { %v60_v16 = vsel %vm59_vm2, %v57_v15, -inf }
  0xae   :  { %61 = vmax.xlane.f32.xlu1 %v60_v16 }
 0x13b   :  { %v62_v20 = vpop.xlane.xlu1 %61 }
 0x13c   :  { %v67_v21 = vrot.slane %v62_v20, %v66_v18  ;;  %v71_v22 = vrot.slane %v62_v20, %v70_v19 }
 0x13e   :  { %v74_v23 = vsub.f32 %v40_v10, %v67_v21  ;;  %v75_v24 = vsub.f32 %v43_v12, %v71_v22 }
 0x140   :  { %v76_v25 = vmul.f32 1.442695, %v74_v23  ;;  %v78_v26 = vmul.f32 1.442695, %v75_v24 }
 0x142   :  { %157 = vpow2.f32 %v76_v25 }
 0x143   :  { %159 = vpow2.f32 %v78_v26 }
 0x14c   :  { %v158_v27 = vpop.eup %157 }
 0x14d   :  { %v160_v28 = vpop.eup %159  ;;  %83 = vperm.xlu1 %155, %v158_v27  }
 0x14e   :  { %86 = vperm.xlu0 %156, %v160_v28  }
 0x1cc   :  { %v84_v29 = vpop.permute.xlu1 %83 }
 0x1cd   :  { %v87_v30 = vpop.permute.xlu0 %86  ;;  %v91_v31 = vrot.slane %v84_v29, %v50_v11 }
 0x1ce   :  { %v95_v32 = vrot.slane %v87_v30, %v50_v11 }
 0x1d0   :  { %v96_v33 = vsel %vm56_vm1, %v95_v32, %v91_v31 }
 0x1d1   :  { %v98_v34 = vsel %vm59_vm2, %v96_v33, 0.0 }
 0x1d2   :  { %99 = vadd.xlane.f32.xlu1 %v98_v34 }
 0x25f   :  { %v100_v35 = vpop.xlane.xlu1 %99 }
 0x260   :  { %161 = vrcp.f32 %v100_v35 }
 0x26a   :  { %v162_v36 = vpop.eup %161 }
 0x26b   :  { %v106_v37 = vrot.slane %v162_v36, %v66_v18  ;;  %v110_v39 = vrot.slane %v162_v36, %v70_v19 }
 0x26d   :  { %v113_v38 = vmul.f32 %v158_v27, %v106_v37  ;;  %v114_v40 = vmul.f32 %v160_v28, %v110_v39 }
 0x26f   :  { %118 = vperm.xlu0 %156, %v113_v38  }
 0x273   :  { %121 = vperm.xlu0 %156, %v114_v40  }
 0x2ee   :  { %v119_v41 = vpop.permute.xlu0 %118 }
 0x2ef   :  { %v126_v43 = vrot.slane %v119_v41, %v50_v11 }
 0x2f2   :  { %v122_v42 = vpop.permute.xlu0 %121 }
 0x2f3   :  { %v130_v44 = vrot.slane %v122_v42, %v50_v11 }
 0x2f5   :  { %v131_v45 = vsel %vm56_vm1, %v130_v44, %v126_v43 }
 0x2f6   :  { %133 = vst.msk [vmem:[#allocation5] sm:$0x3] %vm59_vm2, %v131_v45 }
 0x2f7   :  { %196 = shalt.err (!%p193_p12)
}
 0x2f8   :  { %s197_s28 = scalar_lea.hbm %s266_s2, 32 }
 0x2f9   :  { %p198_p13 = scmp.ne.s32.totalorder %s266_s2, %s197_s28  ;;  %p201_p0 = scmp.lt.u32.totalorder %s197_s28, %s266_s2 }
 0x2fb   :  { %p203_p1 = pnand %p201_p0, %p198_p13 }
 0x2fd   :  { %206 = shalt.err (!%p203_p1)
}
 0x2fe   :  { %143 = dma.vmem_to_hbm [thread:$0]  %s141_s1, 32, %s266_s2, [#allocation4]  }
 0x2ff   :  { %209 = dma.done.wait [#allocation4], 32  }
 0x300   :  { %210 = vsyncadd [#allocation4], 4294967264 }
 0x301   :  { %147 = vsyncpa [#allocation3], 1 }
 0x302   :  { %148 = vsyncpa [#allocation4], 1 }

</bundles_post_ra>
